<compile_context>
chip_gen: v6e
topology: v6e:2x2x1
jax: 0.10.0
libtpu: 0.0.40
codegen_flags: <defaults>
</compile_context>

<pallas_src>
import functools

import jax
import jax.numpy as jnp
from jax.experimental import pallas as pl
from jax.experimental.pallas import tpu as pltpu

EPS = 1e-5  # nn.LayerNorm default


def _adaln_kernel(x_ref, gb_ref, o_ref, *, inv_d):
    # x_ref : (BB, TN, Dp)  batch/sequence tile (zero-padded along Dp)
    # gb_ref: (BB, 2, Dp)   row 0 = gamma, row 1 = beta (f32)
    # o_ref : (BB, TN, Dp)
    xf = x_ref[...].astype(jnp.float32)

    # Single-pass moments over the feature axis. Zero padding along Dp does
    # not perturb the sums; dividing by the *true* D (inv_d) keeps stats exact.
    s1 = jnp.sum(xf, axis=-1, keepdims=True)                 # (BB, TN, 1)
    s2 = jnp.sum(xf * xf, axis=-1, keepdims=True)            # (BB, TN, 1)
    mean = s1 * inv_d
    # Clamp: E[x^2] - E[x]^2 can cancel slightly negative -> NaN from rsqrt.
    var = jnp.maximum(s2 * inv_d - mean * mean, 0.0)
    inv_std = jax.lax.rsqrt(var + EPS)                       # (BB, TN, 1)

    gamma = gb_ref[:, 0:1, :]                                # (BB, 1, Dp) f32
    beta = gb_ref[:, 1:2, :]                                 # (BB, 1, Dp) f32

    # Streaming pass: 3 VALU ops / element (sub, mul, add); inv_std*gamma is a
    # cheap per-row (BB,1,Dp) op. Keeps the kernel under the VALU issue rate
    # even at v7x bandwidth.
    out = (xf - mean) * (inv_std * gamma) + beta
    o_ref[...] = out.astype(o_ref.dtype)


def _vmem_capacity_bytes():
    try:
        cap = getattr(pltpu.get_tpu_info(), "vmem_capacity_bytes", None)
        if cap:
            return int(cap)
    except Exception:
        pass
    return 64 << 20  # conservative default (v7x per-TensorCore)


def _budgets():
    """Returns (tile_budget_bytes, scoped_vmem_cap_bytes), generation-aware."""
    cap = _vmem_capacity_bytes()
    if cap >= (96 << 20):      # v5e / v6e: 128 MiB physical VMEM
        return 48 << 20, 64 << 20
    # v7x: 64 MiB per TensorCore -> smaller tiles, smaller scoped request.
    return 16 << 20, 32 << 20


def _round_tn(tn, n):
    tn = max(1, min(tn, n))
    if tn < n:
        tn = max(8, (tn // 8) * 8)     # keep second-to-last dim sublane-aligned
        if tn >= n:
            tn = n
    return tn


def _pick_block(b, n, dp, itemsize, tile_budget, block_rows=None):
    """Choose (BB, TN) so the per-block VMEM footprint fits the tile budget.

    Per-row accounting: in + out tiles double-buffered (4 * itemsize bytes)
    plus two f32 intermediates (upcast x, pre-downcast out) = 8 bytes.
    """
    per_row = dp * (4 * itemsize + 8)
    max_rows = max(8, tile_budget // per_row)
    if block_rows is not None:
        return 1, _round_tn(block_rows, n)
    if n <= max_rows:
        # Whole sequence fits in one block: fold batch rows in so small-N
        # workloads still issue large, lane/sublane-dense DMAs.
        bb = max(1, min(b, max_rows // n))
        return bb, n
    return 1, _round_tn(max_rows, n)


def adaptive_layer_norm(x, cond, w, b, *, block_rows=None):
    """x: (B, N, D), cond: (B, Dc), w: (Dc, 2D) (torch weight transposed), b: (2D,)."""
    B, N, D = x.shape
    Dc = cond.shape[-1]
    assert w.shape == (Dc, 2 * D), "w must be the torch Linear weight transposed: (Dc, 2*D)"
    assert b.shape == (2 * D,)

    # ---- cond branch hoisted to XLA: Rearrange -> SiLU -> Linear -> chunk ----
    c = cond.astype(jnp.float32)
    c = c * jax.nn.sigmoid(c)                                    # SiLU
    proj = c @ w.astype(jnp.float32) + b.astype(jnp.float32)     # (B, 2D)
    gb = jnp.stack([proj[:, :D], proj[:, D:]], axis=1)           # (B, 2, D) f32

    # ---- pad the feature axis to a lane-dense multiple of 128 ----
    Dp = ((D + 127) // 128) * 128
    if Dp != D:
        x_in = jnp.pad(x, ((0, 0), (0, 0), (0, Dp - D)))
        gb = jnp.pad(gb, ((0, 0), (0, 0), (0, Dp - D)))
    else:
        x_in = x

    itemsize = jnp.dtype(x.dtype).itemsize
    tile_budget, scoped_cap = _budgets()
    bb, tn = _pick_block(B, N, Dp, itemsize, tile_budget, block_rows)
    grid = (pl.cdiv(B, bb), pl.cdiv(N, tn))

    # Scoped-VMEM request: double-buffered in/out tiles + f32 intermediates +
    # the (tiny) gamma/beta block + margin, capped per generation.
    tile_bytes = bb * tn * Dp * itemsize
    f32_bytes = bb * tn * Dp * 4
    vmem_limit = 4 * tile_bytes + 2 * f32_bytes + 4 * (bb * 2 * Dp * 4) + (2 << 20)
    vmem_limit = int(min(max(vmem_limit, 16 << 20), scoped_cap))

    kernel = functools.partial(_adaln_kernel, inv_d=float(1.0 / D))

    # TODO(synk): if a profile shows exposed DMA at the smaller v7x tiles, add
    # pipeline_mode=pl.Buffered(3) on the x in/out specs.
    out = pl.pallas_call(
        kernel,
        out_shape=jax.ShapeDtypeStruct((B, N, Dp), x.dtype),
        grid_spec=pltpu.PrefetchScalarGridSpec(
            num_scalar_prefetch=0,
            grid=grid,
            in_specs=[
                pl.BlockSpec((bb, tn, Dp), lambda i, j: (i, j, 0)),   # x tile
                pl.BlockSpec((bb, 2, Dp), lambda i, j: (i, 0, 0)),    # gamma/beta rows
            ],
            out_specs=pl.BlockSpec((bb, tn, Dp), lambda i, j: (i, j, 0)),
        ),
        compiler_params=pltpu.CompilerParams(
            dimension_semantics=("parallel", "parallel"),
            vmem_limit_bytes=vmem_limit,
        ),
    )(x_in, gb)

    if Dp != D:
        out = out[..., :D]
    return out


def adaptive_layer_norm_ref(x, cond, w, b):
    """Pure-JAX reference matching the PyTorch forward."""
    xf = x.astype(jnp.float32)
    mean = jnp.mean(xf, axis=-1, keepdims=True)
    var = jnp.mean((xf - mean) ** 2, axis=-1, keepdims=True)
    xn = (xf - mean) / jnp.sqrt(var + EPS)
    c = cond.astype(jnp.float32)
    c = c * jax.nn.sigmoid(c)
    proj = c @ w.astype(jnp.float32) + b.astype(jnp.float32)    # (B, 2D)
    d = x.shape[-1]
    gamma = proj[:, None, :d]
    beta = proj[:, None, d:]
    return (xn * gamma + beta).astype(x.dtype)


if __name__ == "__main__":
    B, N, D, Dc = 2, 8, 32, 16

    key = jax.random.PRNGKey(0)
    kx, kc, kw = jax.random.split(key, 3)

    x = jax.random.normal(kx, (B, N, D), dtype=jnp.float32)
    cond = jax.random.normal(kc, (B, Dc), dtype=jnp.float32)

    # Parameters of cond_linear = nn.Linear(Dc, 2*D).
    # The module's __init__ zero-inits the weight and sets bias = [ones(D), zeros(D)];
    # a small deterministic random weight is used so the conditioning path is exercised.
    w = 0.05 * jax.random.normal(kw, (Dc, 2 * D), dtype=jnp.float32)
    b = jnp.concatenate([jnp.ones((D,), jnp.float32),
                         jnp.zeros((D,), jnp.float32)])

    out = adaptive_layer_norm(x, cond, w, b)
    out = jax.block_until_ready(out)

    ref = adaptive_layer_norm_ref(x, cond, w, b)
    assert out.shape == (B, N, D)
    assert jnp.allclose(out, ref, atol=1e-5, rtol=1e-5), "mismatch vs reference"

    print("KERNEL_OK")
</pallas_src>

<mosaic_0001>
module attributes {stable_mosaic.version = 11 : i64} {
  func.func @_adaln_kernel(%arg0: i32, %arg1: i32, %arg2: memref<2x8x128xf32, #tpu.memory_space<vmem>>, %arg3: memref<2x2x128xf32, #tpu.memory_space<vmem>>, %arg4: memref<2x8x128xf32, #tpu.memory_space<vmem>>) attributes {dimension_semantics = [#tpu.dimension_semantics<parallel>, #tpu.dimension_semantics<parallel>], iteration_bounds = array<i64: 1, 1>, scalar_prefetch = 0 : i64, scratch_operands = 0 : i64, tpu.core_type = #tpu.core_type<tc>, window_params = [{transform_indices = @transform_0, window_bounds = array<i64: 2, 8, 128>}, {transform_indices = @transform_1, window_bounds = array<i64: 2, 2, 128>}, {transform_indices = @transform_2, window_bounds = array<i64: 2, 8, 128>}]} {
    %c0 = arith.constant 0 : index
    %c0_0 = arith.constant 0 : index
    %c0_1 = arith.constant 0 : index
    %0 = vector.load %arg2[%c0, %c0_0, %c0_1] : memref<2x8x128xf32, #tpu.memory_space<vmem>>, vector<2x8x128xf32>
    %cst = arith.constant dense<0.000000e+00> : vector<2x8xf32>
    %1 = vector.multi_reduction <add>, %0, %cst [2] : vector<2x8x128xf32> to vector<2x8xf32>
    %2 = vector.shape_cast %1 : vector<2x8xf32> to vector<2x8x1xf32>
    %3 = arith.mulf %0, %0 : vector<2x8x128xf32>
    %cst_2 = arith.constant dense<0.000000e+00> : vector<2x8xf32>
    %4 = vector.multi_reduction <add>, %3, %cst_2 [2] : vector<2x8x128xf32> to vector<2x8xf32>
    %5 = vector.shape_cast %4 : vector<2x8xf32> to vector<2x8x1xf32>
    %cst_3 = arith.constant 3.125000e-02 : f32
    %6 = vector.broadcast %cst_3 : f32 to vector<2x8x1xf32>
    %7 = arith.mulf %2, %6 : vector<2x8x1xf32>
    %cst_4 = arith.constant 3.125000e-02 : f32
    %8 = vector.broadcast %cst_4 : f32 to vector<2x8x1xf32>
    %9 = arith.mulf %5, %8 : vector<2x8x1xf32>
    %10 = arith.mulf %7, %7 : vector<2x8x1xf32>
    %11 = arith.subf %9, %10 : vector<2x8x1xf32>
    %cst_5 = arith.constant 0.000000e+00 : f32
    %12 = vector.broadcast %cst_5 : f32 to vector<2x8x1xf32>
    %13 = arith.maximumf %11, %12 : vector<2x8x1xf32>
    %cst_6 = arith.constant 9.99999974E-6 : f32
    %14 = vector.broadcast %cst_6 : f32 to vector<2x8x1xf32>
    %15 = arith.addf %13, %14 : vector<2x8x1xf32>
    %16 = math.rsqrt %15 : vector<2x8x1xf32>
    %c0_7 = arith.constant 0 : index
    %c0_8 = arith.constant 0 : index
    %c0_9 = arith.constant 0 : index
    %17 = vector.load %arg3[%c0_7, %c0_8, %c0_9] : memref<2x2x128xf32, #tpu.memory_space<vmem>>, vector<2x1x128xf32>
    %c0_10 = arith.constant 0 : index
    %c1 = arith.constant 1 : index
    %c0_11 = arith.constant 0 : index
    %18 = vector.load %arg3[%c0_10, %c1, %c0_11] : memref<2x2x128xf32, #tpu.memory_space<vmem>>, vector<2x1x128xf32>
    %19 = vector.broadcast %7 : vector<2x8x1xf32> to vector<2x8x128xf32>
    %20 = arith.subf %0, %19 : vector<2x8x128xf32>
    %21 = vector.broadcast %16 : vector<2x8x1xf32> to vector<2x8x128xf32>
    %22 = vector.broadcast %17 : vector<2x1x128xf32> to vector<2x8x128xf32>
    %23 = arith.mulf %21, %22 : vector<2x8x128xf32>
    %24 = arith.mulf %20, %23 : vector<2x8x128xf32>
    %25 = vector.broadcast %18 : vector<2x1x128xf32> to vector<2x8x128xf32>
    %26 = arith.addf %24, %25 : vector<2x8x128xf32>
    %c0_12 = arith.constant 0 : index
    %c0_13 = arith.constant 0 : index
    %c0_14 = arith.constant 0 : index
    %27 = vector.load %arg4[%c0_12, %c0_13, %c0_14] : memref<2x8x128xf32, #tpu.memory_space<vmem>>, vector<2x8x128xf32>
    tpu.vector_store %arg4[%c0_12, %c0_13, %c0_14], %26 {strides = array<i32>} : memref<2x8x128xf32, #tpu.memory_space<vmem>>, vector<2x8x128xf32>,
    return
  }
  func.func @transform_0(%arg0: i32, %arg1: i32) -> (i32, i32, i32) {
    %c0_i32 = arith.constant 0 : i32
    %c0_i32_0 = arith.constant 0 : i32
    return %arg0, %arg1, %c0_i32 : i32, i32, i32
  }
  func.func @transform_1(%arg0: i32, %arg1: i32) -> (i32, i32, i32) {
    %c0_i32 = arith.constant 0 : i32
    %c0_i32_0 = arith.constant 0 : i32
    %c0_i32_1 = arith.constant 0 : i32
    return %arg0, %c0_i32, %c0_i32_0 : i32, i32, i32
  }
  func.func @transform_2(%arg0: i32, %arg1: i32) -> (i32, i32, i32) {
    %c0_i32 = arith.constant 0 : i32
    %c0_i32_0 = arith.constant 0 : i32
    return %arg0, %arg1, %c0_i32 : i32, i32, i32
  }
}

</mosaic_0001>

<bundles_post_ra>
// kernel: tpu_custom_call.1
= control target key start
LH: loop header
LB: loop body
LE: loop exit
PB: predicated region body
PF: predicated region fallthrough
CT: control target
= control target key end

     0   :  { %7 = vsyncpa [#allocation3], 0  ;;  %s232_s0 = inlined_call_operand.hbm [shape: f32[2,8,128], index: 0, kind: input, shape index: {}]   ;;  %s233_s1 = inlined_call_operand.hbm [shape: f32[2,2,128], index: 1, kind: input, shape index: {}]   ;;  %s234_s2 = inlined_call_operand.hbm [shape: f32[2,8,128], index: 2, kind: output, shape index: {}]  }
   0x1   :  { %8 = vsyncpa [#allocation6], 0 }
   0x2   :  { %9 = vsyncpa [#allocation4], 0  ;;  %s195_s9 = smov [#allocation2]  }
   0x3   :  { %s15_s10 = sshll.u32 %s195_s9, 4  ;;  %s16_s10 = int_to_ptr.vmem [resolvable:$true] %s15_s10 }
   0x4   :  { %s137_s11 = scalar_lea.vmem %s16_s10, 256  ;;  %p142_p1 = scmp.lt.s32.totalorder %s16_s10, %s16_s10 }
   0x5   :  { %p138_p0 = scmp.ne.s32.totalorder %s16_s10, %s137_s11  ;;  %p143_p2 = scmp.lt.s32.totalorder %s137_s11, %s137_s11 }
   0x7   :  { %p144_p3 = por %p143_p2, %p142_p1 }
   0x9   :  { %p145_p4 = pnand %p144_p3, %p138_p0 }
   0xb   :  { %148 = shalt.err (!%p145_p4)
}
   0xc   :  { %s196_s12 = smov 128   ;;  %s197_s13 = smov 8  }
   0xd   :  { %21 = dma.hbm_to_vmem [thread:$0]  %s232_s0, 256, %s16_s10, [#allocation3], %s196_s12, %s196_s12, %s197_s13  }
   0xe   :  { %s198_s16 = smov [#allocation5]  }
   0xf   :  { %s27_s17 = sshll.u32 %s198_s16, 4  ;;  %s28_s17 = int_to_ptr.vmem [resolvable:$true] %s27_s17 }
  0x10   :  { %s157_s18 = scalar_lea.vmem %s28_s17, 64  ;;  %p162_p6 = scmp.lt.s32.totalorder %s28_s17, %s28_s17 }
  0x11   :  { %p158_p5 = scmp.ne.s32.totalorder %s28_s17, %s157_s18  ;;  %p163_p7 = scmp.lt.s32.totalorder %s157_s18, %s157_s18 }
  0x13   :  { %p164_p8 = por %p163_p7, %p162_p6 }
  0x15   :  { %p165_p9 = pnand %p164_p8, %p158_p5 }
  0x17   :  { %168 = shalt.err (!%p165_p9)
}
  0x18   :  { %s199_s19 = smov 32   ;;  %s200_s20 = smov 2  }
  0x19   :  { %33 = dma.hbm_to_vmem [thread:$0]  %s233_s1, 64, %s28_s17, [#allocation6], %s199_s19, %s199_s19, %s200_s20  }
  0x1a   :  { %189 = dma.done.wait [#allocation3], 256  }
  0x1b   :  { %190 = vsyncadd [#allocation3], 4294967040 }
  0x1c   :  { %191 = dma.done.wait [#allocation6], 64  }
  0x1d   :  { %192 = vsyncadd [#allocation6], 4294967232  ;;  %v40_v0 = vld [vmem:[#allocation2] sm:$0xff]  ;;  %v41_v1 = vld [vmem:[#allocation2 + $0x8] sm:$0xff]  ;;  %s201_s0 = smov [#allocation7]  }
  0x1e   :  { %42 = vadd.xlane.f32.xlu0 %v40_v0  ;;  %v46_v2 = vmul.f32 %v40_v0, %v40_v0  ;;  %v47_v3 = vmul.f32 %v41_v1, %v41_v1  ;;  %v114_v20 = vld [vmem:[#allocation5] ss:$0 sm:$0xff]  ;;  %v115_v24 = vld [vmem:[#allocation5 + $0x2] ss:$0 sm:$0xff]  ;;  %v116_v25 = vld [vmem:[#allocation5 + $0x1] ss:$0 sm:$0xff] }
  0x1f   :  { %v117_v31 = vld [vmem:[#allocation5 + $0x3] ss:$0 sm:$0xff]  ;;  %s101_s1 = sshll.u32 %s201_s0, 4  ;;  %s102_s1 = int_to_ptr.vmem [resolvable:$true] %s101_s1 }
  0x20   :  { %48 = vadd.xlane.f32.xlu1 %v46_v2  ;;  %s169_s23 = scalar_lea.vmem %s102_s1, 256  ;;  %p174_p11 = scmp.lt.s32.totalorder %s102_s1, %s102_s1 }
  0x21   :  { %p170_p10 = scmp.ne.s32.totalorder %s102_s1, %s169_s23  ;;  %p175_p12 = scmp.lt.s32.totalorder %s169_s23, %s169_s23 }
  0x22   :  { %44 = vadd.xlane.f32.xlu0 %v41_v1 }
  0x23   :  { %p176_p13 = por %p175_p12, %p174_p11 }
  0x24   :  { %50 = vadd.xlane.f32.xlu1 %v47_v3 }
  0x25   :  { %p177_p0 = pnand %p176_p13, %p170_p10 }
  0xa7   :  { %v43_v4 = vpop.xlane.xlu0 %42 }
  0xa8   :  { %v52_v5 = vmul.f32 0.03125, %v43_v4 }
  0xa9   :  { %v49_v6 = vpop.xlane.xlu1 %48 }
  0xaa   :  { %v56_v7 = vmul.f32 %v52_v5, %v52_v5  ;;  %v54_v8 = vmul.f32 0.03125, %v49_v6  ;;  %v70_v22 = vsub.f32 %v40_v0, %v52_v5 }
  0xab   :  { %v45_v9 = vpop.xlane.xlu0 %44 }
  0xac   :  { %v58_v10 = vsub.f32 %v54_v8, %v56_v7  ;;  %v53_v11 = vmul.f32 0.03125, %v45_v9 }
  0xad   :  { %v51_v12 = vpop.xlane.xlu1 %50 }
  0xae   :  { %v60_v13 = vmax.f32 %v58_v10, 0.0  ;;  %v57_v14 = vmul.f32 %v53_v11, %v53_v11  ;;  %v55_v15 = vmul.f32 0.03125, %v51_v12  ;;  %v71_v28 = vsub.f32 %v41_v1, %v53_v11 }
  0xb0   :  { %v62_v16 = vadd.f32 1e-05, %v60_v13  ;;  %v59_v17 = vsub.f32 %v55_v15, %v57_v14 }
  0xb2   :  { %125 = vrsqrt.f32 %v62_v16  ;;  %v61_v18 = vmax.f32 %v59_v17, 0.0 }
  0xb4   :  { %v63_v19 = vadd.f32 1e-05, %v61_v18 }
  0xb6   :  { %127 = vrsqrt.f32 %v63_v19 }
  0xbf   :  { %v126_v21 = vpop.eup %125 }
  0xc0   :  { %v80_v23 = vmul.f32 %v126_v21, %v114_v20 }
  0xc2   :  { %v82_v26 = vmul.f32 %v80_v23, %v70_v22 }
  0xc3   :  { %v128_v27 = vpop.eup %127 }
  0xc4   :  { %v81_v29 = vmul.f32 %v128_v27, %v115_v24  ;;  %v92_v30 = vadd.f32 %v116_v25, %v82_v26 }
  0xc6   :  { %v83_v32 = vmul.f32 %v81_v29, %v71_v28  ;;  %94 = vst [vmem:[#allocation7] sm:$0xff] %v92_v30 }
  0xc8   :  { %v93_v33 = vadd.f32 %v117_v31, %v83_v32 }
  0xca   :  { %95 = vst [vmem:[#allocation7 + $0x8] sm:$0xff] %v93_v33 }
  0xcb   :  { %180 = shalt.err (!%p177_p0)
}
  0xcc   :  { %107 = dma.vmem_to_hbm [thread:$0]  %s102_s1, 256, %s234_s2, [#allocation4], %s196_s12, %s196_s12, %s197_s13  }
  0xcd   :  { %193 = dma.done.wait [#allocation4], 256  }
  0xce   :  { %194 = vsyncadd [#allocation4], 4294967040 }
  0xcf   :  { %111 = vsyncpa [#allocation3], 1 }
  0xd0   :  { %112 = vsyncpa [#allocation6], 1 }
  0xd1   :  { %113 = vsyncpa [#allocation4], 1 }

</bundles_post_ra>
